<compile_context>
chip_gen: v7x
topology: tpu7x:2x2x1
jax: 0.10.0
libtpu: 0.0.40
codegen_flags: <defaults>
</compile_context>

<pallas_src>
import functools

import jax
import jax.numpy as jnp
from jax import lax
from jax.experimental import pallas as pl
from jax.experimental.pallas import tpu as pltpu


# ----------------------------------------------------------------------------
# Fused SA kernel: one grid step = one (batch, group-pair)
# ----------------------------------------------------------------------------
def _sa_kernel(xlo_ref, xhi_ref, p0_ref, p1_ref, prm_ref, o_ref, *, n_branch, eps):
    # xlo/xhi: (1, Cg, HW)    channels of group gi / group gi + G/2
    # p0/p1:   (2*Cg, Cg)     0/1 interleave matrices (rows 0::2 / 1::2 = identity)
    # prm:     (6, 2*Ch, 1)   [cweight, cbias, sweight, sbias, gn_w, gn_b], each value
    #                         repeated x2 to match the interleaved channel order
    # o:       (1, 2*Cg, HW)  shuffled output channels [2*gi*Cg, 2*(gi+1)*Cg)
    xlo = xlo_ref[0].astype(jnp.float32)
    xhi = xhi_ref[0].astype(jnp.float32)

    # Interleave the two groups along the channel (sublane) axis using the MXU:
    #   xi[2u + s, :] = (xlo if s == 0 else xhi)[u, :]
    xi = (jnp.dot(p0_ref[...], xlo, preferred_element_type=jnp.float32) +
          jnp.dot(p1_ref[...], xhi, preferred_element_type=jnp.float32))

    hw = xi.shape[-1]
    inv_hw = 1.0 / hw
    nb2 = 2 * n_branch                       # interleaved channels per branch (= Cg)
    x0 = xi[:nb2]                            # channel-attention branch (both groups)
    x1 = xi[nb2:]                            # spatial-attention branch (both groups)

    prm = prm_ref[...]
    cw, cb = prm[0], prm[1]
    sw, sb = prm[2], prm[3]
    gw, gb = prm[4], prm[5]

    # channel attention: global average pool -> per-channel affine -> sigmoid gate
    m0 = jnp.sum(x0, axis=-1, keepdims=True) * inv_hw
    y0 = x0 * jax.nn.sigmoid(cw * m0 + cb)

    # spatial attention: per-channel GroupNorm (1 ch/group) -> affine -> sigmoid gate
    m1 = jnp.sum(x1, axis=-1, keepdims=True) * inv_hw
    xc = x1 - m1
    v1 = jnp.sum(xc * xc, axis=-1, keepdims=True) * inv_hw
    xn = xc * lax.rsqrt(v1 + eps)
    y1 = x1 * jax.nn.sigmoid(sw * (xn * gw + gb) + sb)

    # stores are sublane-aligned (nb2 is a multiple of 8) and lane-dense (HW last)
    o_ref[0, :nb2, :] = y0.astype(o_ref.dtype)
    o_ref[0, nb2:, :] = y1.astype(o_ref.dtype)


# ----------------------------------------------------------------------------
# Wrapper
# ----------------------------------------------------------------------------
def sa_forward(x, cweight, cbias, sweight, sbias, gn_w, gn_b, G, eps=1e-5):
    b, c, h, w = x.shape
    assert c % (2 * G) == 0, "channel must be divisible by 2*G"
    assert G % 2 == 0, "G must be even (channel_shuffle pairs groups g and g+G/2)"
    cg = c // G                 # channels per group
    ch = c // (2 * G)           # channels per branch inside a group
    hw = h * w
    npairs = G // 2
    assert cg % 8 == 0, "channels-per-group must be a multiple of 8 (sublane tiling)"

    xr = x.reshape(b, c, hw)    # free reshape: channels on sublanes, h*w lane-dense

    # interleave permutations: row 2u+s of the pair block <- row u of group s
    eye = jnp.eye(cg, dtype=jnp.float32)
    p0 = jnp.zeros((2 * cg, cg), jnp.float32).at[0::2, :].set(eye)
    p1 = jnp.zeros((2 * cg, cg), jnp.float32).at[1::2, :].set(eye)

    # per-channel parameters repeated x2 to match the interleaved channel order
    prm = jnp.stack(
        [jnp.repeat(cweight, 2), jnp.repeat(cbias, 2),
         jnp.repeat(sweight, 2), jnp.repeat(sbias, 2),
         jnp.repeat(gn_w, 2), jnp.repeat(gn_b, 2)],
        axis=0,
    ).reshape(6, 2 * ch, 1).astype(jnp.float32)

    itemsize = jnp.dtype(x.dtype).itemsize
    cost = pl.CostEstimate(
        flops=int(b * c * hw * (4 * cg + 30)),
        transcendentals=int(b * c * hw),
        bytes_accessed=int(2 * b * c * hw * itemsize + 2 * (2 * cg) * cg * 4),
    )

    kern = functools.partial(_sa_kernel, n_branch=ch, eps=eps)
    out = pl.pallas_call(
        kern,
        out_shape=jax.ShapeDtypeStruct((b, c, hw), x.dtype),
        grid_spec=pltpu.PrefetchScalarGridSpec(
            num_scalar_prefetch=0,
            grid=(b, npairs),
            in_specs=[
                # group gi ("lo" half of the pair)
                pl.BlockSpec((1, cg, hw), lambda bi, gi: (bi, gi, 0)),
                # group gi + G/2 ("hi" half of the pair) -- same array, shifted block
                pl.BlockSpec((1, cg, hw), lambda bi, gi: (bi, gi + npairs, 0)),
                # resident permutation matrices + parameters (constant block index)
                pl.BlockSpec((2 * cg, cg), lambda bi, gi: (0, 0)),
                pl.BlockSpec((2 * cg, cg), lambda bi, gi: (0, 0)),
                pl.BlockSpec((6, 2 * ch, 1), lambda bi, gi: (0, 0, 0)),
            ],
            out_specs=pl.BlockSpec((1, 2 * cg, hw), lambda bi, gi: (bi, gi, 0)),
        ),
        compiler_params=pltpu.CompilerParams(
            dimension_semantics=("parallel", "parallel"),
            vmem_limit_bytes=48 * 1024 * 1024,
        ),
        cost_estimate=cost,
    )(xr, xr, p0, p1, prm)

    return out.reshape(b, c, h, w)   # free reshape: output is already shuffled


# ----------------------------------------------------------------------------
# Pure-JAX reference (mirrors the PyTorch module exactly)
# ----------------------------------------------------------------------------
def sa_reference(x, cweight, cbias, sweight, sbias, gn_w, gn_b, G, eps=1e-5):
    b, c, h, w = x.shape
    ch = c // (2 * G)
    xg = x.reshape(b * G, c // G, h, w)
    x0, x1 = xg[:, :ch], xg[:, ch:]
    # channel attention
    s = jnp.mean(x0, axis=(2, 3), keepdims=True)
    s = cweight.reshape(1, ch, 1, 1) * s + cbias.reshape(1, ch, 1, 1)
    yc = x0 * jax.nn.sigmoid(s)
    # spatial attention (GroupNorm with 1 channel per group)
    m = jnp.mean(x1, axis=(2, 3), keepdims=True)
    v = jnp.mean((x1 - m) ** 2, axis=(2, 3), keepdims=True)
    xn = (x1 - m) / jnp.sqrt(v + eps)
    xn = xn * gn_w.reshape(1, ch, 1, 1) + gn_b.reshape(1, ch, 1, 1)
    t = sweight.reshape(1, ch, 1, 1) * xn + sbias.reshape(1, ch, 1, 1)
    ys = x1 * jax.nn.sigmoid(t)
    out = jnp.concatenate([yc, ys], axis=1).reshape(b, c, h, w)
    # channel_shuffle(out, 2)
    out = out.reshape(b, 2, c // 2, h, w).transpose(0, 2, 1, 3, 4).reshape(b, c, h, w)
    return out


# ----------------------------------------------------------------------------
# Main
# ----------------------------------------------------------------------------
if __name__ == "__main__":
    key = jax.random.PRNGKey(0)
    b, c, h, w = 2, 64, 16, 16
    G = 8                      # SA default grouping; c // (2G) = 4 branch channels
    ch = c // (2 * G)

    ks = jax.random.split(key, 8)
    x = jax.random.normal(ks[0], (b, c, h, w), jnp.float32)   # NCHW, like PyTorch

    # module parameters (init is zeros/ones; use non-trivial values so the
    # correctness check actually exercises every term)
    cweight = 0.5 * jax.random.normal(ks[1], (ch,), jnp.float32)
    cbias = 1.0 + 0.1 * jax.random.normal(ks[2], (ch,), jnp.float32)
    sweight = 0.5 * jax.random.normal(ks[3], (ch,), jnp.float32)
    sbias = 1.0 + 0.1 * jax.random.normal(ks[4], (ch,), jnp.float32)
    gn_w = 1.0 + 0.1 * jax.random.normal(ks[5], (ch,), jnp.float32)
    gn_b = 0.1 * jax.random.normal(ks[6], (ch,), jnp.float32)

    out = jax.block_until_ready(
        sa_forward(x, cweight, cbias, sweight, sbias, gn_w, gn_b, G))
    ref = jax.block_until_ready(
        sa_reference(x, cweight, cbias, sweight, sbias, gn_w, gn_b, G))

    assert out.shape == (b, c, h, w)
    assert jnp.allclose(out, ref, atol=1e-4, rtol=1e-4), "mismatch vs JAX reference"

    print("KERNEL_OK")
</pallas_src>

<mosaic_0001>
module attributes {stable_mosaic.version = 11 : i64} {
  func.func @_sa_kernel(%arg0: i32, %arg1: i32, %arg2: memref<1x8x256xf32, #tpu.memory_space<vmem>>, %arg3: memref<1x8x256xf32, #tpu.memory_space<vmem>>, %arg4: memref<16x8xf32, #tpu.memory_space<vmem>>, %arg5: memref<16x8xf32, #tpu.memory_space<vmem>>, %arg6: memref<6x8x1xf32, #tpu.memory_space<vmem>>, %arg7: memref<1x16x256xf32, #tpu.memory_space<vmem>>) attributes {dimension_semantics = [#tpu.dimension_semantics<parallel>, #tpu.dimension_semantics<parallel>], iteration_bounds = array<i64: 2, 4>, scalar_prefetch = 0 : i64, scratch_operands = 0 : i64, tpu.core_type = #tpu.core_type<tc>, window_params = [{transform_indices = @transform_0, window_bounds = array<i64: 1, 8, 256>}, {transform_indices = @transform_1, window_bounds = array<i64: 1, 8, 256>}, {pipeline_mode = #tpu.pipeline_mode<synchronous>, transform_indices = @transform_2, window_bounds = array<i64: 16, 8>}, {pipeline_mode = #tpu.pipeline_mode<synchronous>, transform_indices = @transform_3, window_bounds = array<i64: 16, 8>}, {pipeline_mode = #tpu.pipeline_mode<synchronous>, transform_indices = @transform_4, window_bounds = array<i64: 6, 8, 1>}, {transform_indices = @transform_5, window_bounds = array<i64: 1, 16, 256>}]} {
    %c0 = arith.constant 0 : index
    %c0_0 = arith.constant 0 : index
    %c0_1 = arith.constant 0 : index
    %0 = vector.load %arg2[%c0, %c0_0, %c0_1] : memref<1x8x256xf32, #tpu.memory_space<vmem>>, vector<1x8x256xf32>
    %1 = vector.shape_cast %0 : vector<1x8x256xf32> to vector<8x256xf32>
    %c0_2 = arith.constant 0 : index
    %c0_3 = arith.constant 0 : index
    %c0_4 = arith.constant 0 : index
    %2 = vector.load %arg3[%c0_2, %c0_3, %c0_4] : memref<1x8x256xf32, #tpu.memory_space<vmem>>, vector<1x8x256xf32>
    %3 = vector.shape_cast %2 : vector<1x8x256xf32> to vector<8x256xf32>
    %c0_5 = arith.constant 0 : index
    %c0_6 = arith.constant 0 : index
    %4 = vector.load %arg4[%c0_5, %c0_6] : memref<16x8xf32, #tpu.memory_space<vmem>>, vector<16x8xf32>
    %cst = arith.constant dense<0.000000e+00> : vector<16x256xf32>
    %5 = tpu.matmul %4, %1, %cst {dimension_numbers = #tpu.dot_dimension_numbers<[1], [0], [0], [1], [0, 0, 1, 1], [], []>} : vector<16x8xf32>, vector<8x256xf32>, vector<16x256xf32> -> vector<16x256xf32>
    %c0_7 = arith.constant 0 : index
    %c0_8 = arith.constant 0 : index
    %6 = vector.load %arg5[%c0_7, %c0_8] : memref<16x8xf32, #tpu.memory_space<vmem>>, vector<16x8xf32>
    %cst_9 = arith.constant dense<0.000000e+00> : vector<16x256xf32>
    %7 = tpu.matmul %6, %3, %cst_9 {dimension_numbers = #tpu.dot_dimension_numbers<[1], [0], [0], [1], [0, 0, 1, 1], [], []>} : vector<16x8xf32>, vector<8x256xf32>, vector<16x256xf32> -> vector<16x256xf32>
    %8 = arith.addf %5, %7 : vector<16x256xf32>
    %9 = vector.extract_strided_slice %8 {offsets = [0, 0], sizes = [8, 256], strides = [1, 1]} : vector<16x256xf32> to vector<8x256xf32>
    %10 = vector.extract_strided_slice %8 {offsets = [8, 0], sizes = [8, 256], strides = [1, 1]} : vector<16x256xf32> to vector<8x256xf32>
    %c0_10 = arith.constant 0 : index
    %c0_11 = arith.constant 0 : index
    %c0_12 = arith.constant 0 : index
    %11 = vector.load %arg6[%c0_10, %c0_11, %c0_12] : memref<6x8x1xf32, #tpu.memory_space<vmem>>, vector<6x8x1xf32>
    %12 = vector.extract_strided_slice %11 {offsets = [0, 0, 0], sizes = [1, 8, 1], strides = [1, 1, 1]} : vector<6x8x1xf32> to vector<1x8x1xf32>
    %13 = vector.shape_cast %12 : vector<1x8x1xf32> to vector<8x1xf32>
    %14 = vector.extract_strided_slice %11 {offsets = [1, 0, 0], sizes = [1, 8, 1], strides = [1, 1, 1]} : vector<6x8x1xf32> to vector<1x8x1xf32>
    %15 = vector.shape_cast %14 : vector<1x8x1xf32> to vector<8x1xf32>
    %16 = vector.extract_strided_slice %11 {offsets = [2, 0, 0], sizes = [1, 8, 1], strides = [1, 1, 1]} : vector<6x8x1xf32> to vector<1x8x1xf32>
    %17 = vector.shape_cast %16 : vector<1x8x1xf32> to vector<8x1xf32>
    %18 = vector.extract_strided_slice %11 {offsets = [3, 0, 0], sizes = [1, 8, 1], strides = [1, 1, 1]} : vector<6x8x1xf32> to vector<1x8x1xf32>
    %19 = vector.shape_cast %18 : vector<1x8x1xf32> to vector<8x1xf32>
    %20 = vector.extract_strided_slice %11 {offsets = [4, 0, 0], sizes = [1, 8, 1], strides = [1, 1, 1]} : vector<6x8x1xf32> to vector<1x8x1xf32>
    %21 = vector.shape_cast %20 : vector<1x8x1xf32> to vector<8x1xf32>
    %22 = vector.extract_strided_slice %11 {offsets = [5, 0, 0], sizes = [1, 8, 1], strides = [1, 1, 1]} : vector<6x8x1xf32> to vector<1x8x1xf32>
    %23 = vector.shape_cast %22 : vector<1x8x1xf32> to vector<8x1xf32>
    %cst_13 = arith.constant dense<0.000000e+00> : vector<8xf32>
    %24 = vector.multi_reduction <add>, %9, %cst_13 [1] : vector<8x256xf32> to vector<8xf32>
    %25 = vector.shape_cast %24 : vector<8xf32> to vector<8x1xf32>
    %cst_14 = arith.constant 3.906250e-03 : f32
    %26 = vector.broadcast %cst_14 : f32 to vector<8x1xf32>
    %27 = arith.mulf %25, %26 : vector<8x1xf32>
    %28 = arith.mulf %13, %27 : vector<8x1xf32>
    %29 = arith.addf %28, %15 : vector<8x1xf32>
    %30 = arith.negf %29 : vector<8x1xf32>
    %31 = math.exp %30 : vector<8x1xf32>
    %cst_15 = arith.constant 1.000000e+00 : f32
    %32 = vector.broadcast %cst_15 : f32 to vector<8x1xf32>
    %33 = arith.addf %32, %31 : vector<8x1xf32>
    %34 = arith.divf %32, %33 : vector<8x1xf32>
    %35 = vector.broadcast %34 : vector<8x1xf32> to vector<8x256xf32>
    %36 = arith.mulf %9, %35 : vector<8x256xf32>
    %cst_16 = arith.constant dense<0.000000e+00> : vector<8xf32>
    %37 = vector.multi_reduction <add>, %10, %cst_16 [1] : vector<8x256xf32> to vector<8xf32>
    %38 = vector.shape_cast %37 : vector<8xf32> to vector<8x1xf32>
    %cst_17 = arith.constant 3.906250e-03 : f32
    %39 = vector.broadcast %cst_17 : f32 to vector<8x1xf32>
    %40 = arith.mulf %38, %39 : vector<8x1xf32>
    %41 = vector.broadcast %40 : vector<8x1xf32> to vector<8x256xf32>
    %42 = arith.subf %10, %41 : vector<8x256xf32>
    %43 = arith.mulf %42, %42 : vector<8x256xf32>
    %cst_18 = arith.constant dense<0.000000e+00> : vector<8xf32>
    %44 = vector.multi_reduction <add>, %43, %cst_18 [1] : vector<8x256xf32> to vector<8xf32>
    %45 = vector.shape_cast %44 : vector<8xf32> to vector<8x1xf32>
    %cst_19 = arith.constant 3.906250e-03 : f32
    %46 = vector.broadcast %cst_19 : f32 to vector<8x1xf32>
    %47 = arith.mulf %45, %46 : vector<8x1xf32>
    %cst_20 = arith.constant 9.99999974E-6 : f32
    %48 = vector.broadcast %cst_20 : f32 to vector<8x1xf32>
    %49 = arith.addf %47, %48 : vector<8x1xf32>
    %50 = math.rsqrt %49 : vector<8x1xf32>
    %51 = vector.broadcast %50 : vector<8x1xf32> to vector<8x256xf32>
    %52 = arith.mulf %42, %51 : vector<8x256xf32>
    %53 = vector.broadcast %21 : vector<8x1xf32> to vector<8x256xf32>
    %54 = arith.mulf %52, %53 : vector<8x256xf32>
    %55 = vector.broadcast %23 : vector<8x1xf32> to vector<8x256xf32>
    %56 = arith.addf %54, %55 : vector<8x256xf32>
    %57 = vector.broadcast %17 : vector<8x1xf32> to vector<8x256xf32>
    %58 = arith.mulf %57, %56 : vector<8x256xf32>
    %59 = vector.broadcast %19 : vector<8x1xf32> to vector<8x256xf32>
    %60 = arith.addf %58, %59 : vector<8x256xf32>
    %61 = arith.negf %60 : vector<8x256xf32>
    %62 = math.exp %61 : vector<8x256xf32>
    %cst_21 = arith.constant 1.000000e+00 : f32
    %63 = vector.broadcast %cst_21 : f32 to vector<8x256xf32>
    %64 = arith.addf %63, %62 : vector<8x256xf32>
    %65 = arith.divf %63, %64 : vector<8x256xf32>
    %66 = arith.mulf %10, %65 : vector<8x256xf32>
    %c0_22 = arith.constant 0 : index
    %c0_23 = arith.constant 0 : index
    %c0_24 = arith.constant 0 : index
    %67 = vector.load %arg7[%c0_22, %c0_23, %c0_24] : memref<1x16x256xf32, #tpu.memory_space<vmem>>, vector<1x8x256xf32>
    %68 = vector.shape_cast %67 : vector<1x8x256xf32> to vector<8x256xf32>
    %69 = vector.shape_cast %36 : vector<8x256xf32> to vector<1x8x256xf32>
    tpu.vector_store %arg7[%c0_22, %c0_23, %c0_24], %69 {strides = array<i32>} : memref<1x16x256xf32, #tpu.memory_space<vmem>>, vector<1x8x256xf32>,
    %c0_25 = arith.constant 0 : index
    %c8 = arith.constant 8 : index
    %c0_26 = arith.constant 0 : index
    %70 = vector.load %arg7[%c0_25, %c8, %c0_26] : memref<1x16x256xf32, #tpu.memory_space<vmem>>, vector<1x8x256xf32>
    %71 = vector.shape_cast %70 : vector<1x8x256xf32> to vector<8x256xf32>
    %72 = vector.shape_cast %66 : vector<8x256xf32> to vector<1x8x256xf32>
    tpu.vector_store %arg7[%c0_25, %c8, %c0_26], %72 {strides = array<i32>} : memref<1x16x256xf32, #tpu.memory_space<vmem>>, vector<1x8x256xf32>,
    return
  }
  func.func @transform_0(%arg0: i32, %arg1: i32) -> (i32, i32, i32) {
    %c0_i32 = arith.constant 0 : i32
    %c0_i32_0 = arith.constant 0 : i32
    return %arg0, %arg1, %c0_i32 : i32, i32, i32
  }
  func.func @transform_1(%arg0: i32, %arg1: i32) -> (i32, i32, i32) {
    %c4_i32 = arith.constant 4 : i32
    %0 = arith.addi %arg1, %c4_i32 : i32
    %c0_i32 = arith.constant 0 : i32
    %c0_i32_0 = arith.constant 0 : i32
    return %arg0, %0, %c0_i32 : i32, i32, i32
  }
  func.func @transform_2(%arg0: i32, %arg1: i32) -> (i32, i32) {
    %c0_i32 = arith.constant 0 : i32
    %c0_i32_0 = arith.constant 0 : i32
    %c0_i32_1 = arith.constant 0 : i32
    return %c0_i32, %c0_i32_0 : i32, i32
  }
  func.func @transform_3(%arg0: i32, %arg1: i32) -> (i32, i32) {
    %c0_i32 = arith.constant 0 : i32
    %c0_i32_0 = arith.constant 0 : i32
    %c0_i32_1 = arith.constant 0 : i32
    return %c0_i32, %c0_i32_0 : i32, i32
  }
  func.func @transform_4(%arg0: i32, %arg1: i32) -> (i32, i32, i32) {
    %c0_i32 = arith.constant 0 : i32
    %c0_i32_0 = arith.constant 0 : i32
    %c0_i32_1 = arith.constant 0 : i32
    %c0_i32_2 = arith.constant 0 : i32
    return %c0_i32, %c0_i32_0, %c0_i32_1 : i32, i32, i32
  }
  func.func @transform_5(%arg0: i32, %arg1: i32) -> (i32, i32, i32) {
    %c0_i32 = arith.constant 0 : i32
    %c0_i32_0 = arith.constant 0 : i32
    return %arg0, %arg1, %c0_i32 : i32, i32, i32
  }
}

</mosaic_0001>

<bundles_post_ra>
// kernel: tpu_custom_call.1
= control target key start
LH: loop header
LB: loop body
LE: loop exit
PB: predicated region body
PF: predicated region fallthrough
CT: control target
= control target key end

     0   :  { %s1460_s0 = inlined_call_operand.hbm [shape: f32[2,64,256], index: 0, kind: input, shape index: {}]   ;;  %s1461_s1 = inlined_call_operand.hbm [shape: f32[2,64,256], index: 1, kind: input, shape index: {}]   ;;  %s1462_s2 = inlined_call_operand.vmem [shape: f32[16,8], index: 2, kind: input, shape index: {}]   ;;  %s1463_s3 = inlined_call_operand.vmem [shape: f32[16,8], index: 3, kind: input, shape index: {}]   ;;  %s1464_s4 = inlined_call_operand.vmem [shape: f32[6,8,1], index: 4, kind: input, shape index: {}]   ;;  %s1465_s5 = inlined_call_operand.hbm [shape: f32[2,64,256], index: 5, kind: output, shape index: {}]  }
   0x1   :  { %1477 = sst [smem:[#allocation17_spill]] %s1460_s0 }
   0x2   :  { %1478 = sst [smem:[#allocation18_spill]] %s1465_s5 }
   0x3   :  { %10 = vsyncpa [#allocation3], 0 }
   0x4   :  { %12 = vsyncpa [#allocation3 + $0x1], 0 }
   0x5   :  { %13 = vsyncpa [#allocation6], 0 }
   0x6   :  { %15 = vsyncpa [#allocation6 + $0x1], 0 }
   0x7   :  { %16 = vsyncpa [#allocation4], 0 }
   0x8   :  { %18 = vsyncpa [#allocation4 + $0x1], 0  ;;  %s1090_s18 = smov 0   ;;  %s1092_s19 = smov 0  }
   0x9   :  { %s1094_s20 = smov 0   ;;  %s1096_s21 = smov 0  }
   0xa   :  { %s1098_s22 = smov 0   ;;  %s1100_s23 = smov 0  }
   0xb   :  { %s1102_s24 = smov 0   ;;  %s1104_s25 = smov 0  }
   0xc   :  { %s1106_s26 = smov 0   ;;  %s1108_s27 = smov 0  }
   0xd   :  { %s1110_s28 = smov 0  }
   0xe LB: > { %1479 = sst [smem:[#allocation11_spill]] %s1035_s24  ;;  %s702_s29 = sadd.s32 4294967295, %s1051_s28   ;;  %s1051_s28 = sphi %s1110_s28, %s24_s28   ;;  %s1047_s27 = sphi %s1108_s27, %s1521_s27   ;;  %s1043_s26 = sphi %s1106_s26, %s1520_s26   ;;  %s1039_s25 = sphi %s1104_s25, %s1510_s25   ;;  %s1035_s24 = sphi %s1102_s24, %s1519_s24   ;;  %s1031_s23 = sphi %s1100_s23, %s1518_s23   ;;  %s1027_s22 = sphi %s1098_s22, %s1517_s22   ;;  %s1023_s21 = sphi %s1096_s21, %s1516_s21   ;;  %s1019_s20 = sphi %s1094_s20, %s1515_s20   ;;  %s1015_s19 = sphi %s1092_s19, %s1514_s19   ;;  %s1011_s18 = sphi %s1090_s18, %s1513_s18  }
   0xf   : > { %1480 = sst [smem:[#allocation12_spill]] %s1039_s25  ;;  %s703_s30 = sadd.s32 4294967294, %s1051_s28  }
  0x10   : > { %1481 = sst [smem:[#allocation13_spill]] %s1047_s27  ;;  %s33_s6 = sadd.s32 1, %s1043_s26 }
  0x11   : > { %s36_s7 = sadd.s32 1, %s1047_s27  ;;  %p34_p0 = scmp.ge.s32.totalorder %s33_s6, 4 }
  0x12   : > { %s45_s8 = sadd.s32 1, %s1031_s23  ;;  %p52_p1 = scmp.ne.s32.totalorder %s1031_s23, %s1027_s22 }
  0x13   : > { %p1469_p2 = scmp.eq.s32.totalorder %s1051_s28, 0  ;;  %s1523_s6 = smov (%p34_p0, %s33_s6), 0 }
  0x14   : > { %1482 = sst [smem:[#allocation14_spill]] %s1523_s6  ;;  %s1525_s7 = smov (!%p34_p0, %s36_s7), %s1047_s27 }
  0x15   : > { %s41_s9 = ssub.s32 %s1043_s26, %s1523_s6  ;;  %p1163_p3 = por %p1469_p2, %p52_p1 }
  0x16   : > { %p38_p4 = scmp.ge.s32.totalorder %s1525_s7, 2  ;;  %p58_p5 = scmp.ne.s32.totalorder %s1027_s22, %s1023_s21 }
  0x17   : > { %p1169_p6 = scmp.eq.s32.totalorder %s702_s29, 0  ;;  %s68_s12 = sadd.s32 4, %s1043_s26 }
  0x18   : > { %s1527_s7 = smov (%p38_p4, %s1525_s7), 0  ;;  %s69_s14 = sadd.s32 4, %s1523_s6 }
  0x19   : > { %s1484_s11 = scalar_select %p1169_p6, 1, 0 }
  0x1a   : > { %1485 = sst [smem:[#allocation15_spill]] %s1527_s7  ;;  %p1181_p7 = por %p1169_p6, %p58_p5 }
  0x1b   : > { %s40_s15 = ssub.s32 %s1047_s27, %s1527_s7  ;;  %s71_s16 = ssub.s32 %s68_s12, %s69_s14 }
  0x1c   : > { %s1486_s13 = scalar_select %p1181_p7, 1, 0 }
  0x1d   : > { %s42_s17 = sor.u32 %s41_s9, %s40_s15  ;;  %s72_s5 = sor.u32 %s71_s16, %s40_s15 }
  0x1e   : > { %p43_p8 = scmp.eq.s32.totalorder %s42_s17, 0  ;;  %p1188_p9 = scmp.eq.s32.totalorder %s72_s5, 0 }
  0x1f   : > { %p177_p10 = scmp.eq.s32.totalorder %s702_s29, 7  ;;  %p183_p11 = scmp.eq.s32.totalorder %s703_s30, 7 }
  0x20   : > { %s1193_s24 = scalar_select %p43_p8, %s1031_s23, %s45_s8  }
  0x21   : > { %p1198_p12 = por %p177_p10, %p52_p1  ;;  %p1205_p13 = por %p183_p11, %p58_p5 }
  0x22   : > { %1488 = sst [smem:[#allocation16_spill]] %s1193_s24  ;;  %p1471_p0 = scmp.lt.s32.totalorder %s1051_s28, 8 }
  0x23   : > { %s1489_s6 = scalar_select %p1198_p12, 1, 0 }
  0x24   : > { %s1490_s9 = scalar_select %p1205_p13, 1, 0 }
  0x25   : > { %s212_s5 = sand.u32 1, %s1031_s23   ;;  %s707_s29 = sshll.u32 %s1043_s26, 1 }
  0x26   : > { %s706_s12 = sshll.u32 %s212_s5, 4  ;;  %s708_s14 = sshll.u32 %s1047_s27, 4 }
  0x27   : > { %s1213_s30 = sadd.s32 %s708_s14, %s707_s29  ;;  %s216_s8 = scalar_lea.vmem [#allocation2], %s706_s12 }
  0x28   : > { %s226_s15 = sshll.u32 %s216_s8, 4  ;;  %s1470_s16 = sshll.u32 %s1213_s30, 7  ;;  %s1216_s15 = int_to_ptr.vmem [resolvable:$true] %s226_s15 }
  0x29   : > { %s1491_s0 = sld [smem:[#allocation17_spill]]  ;;  %p1229_p1 = pnand %p1471_p0, %p1163_p3 }
  0x2a   : > { %s213_s12 = scalar_lea.sflag [#allocation3], %s212_s5 }
  0x2b   : > { %p866_p10 = pneg %p1229_p1 }
  0x2f   : > { %s1223_s24 = scalar_lea.hbm %s1491_s0, %s1470_s16  ;;  %s869_s8 = scalar_lea.hbm %s1491_s0, 4096 }
  0x30   : > { %s864_s14 = scalar_lea.hbm %s1223_s24, 256  ;;  %p870_p3 = scmp.lt.u32.totalorder %s1223_s24, %s1491_s0 }
  0x31   : > { %p865_p8 = scmp.ne.s32.totalorder %s1223_s24, %s864_s14  ;;  %p871_p0 = scmp.lt.u32.totalorder %s869_s8, %s864_s14 }
  0x32   : > { %p873_p5 = scmp.lt.u32.totalorder %s864_s14, %s1223_s24 }
  0x33   : > { %p867_p11 = pnand %p866_p10, %p865_p8  ;;  %p872_p4 = por %p871_p0, %p870_p3 }
  0x35   : > { %p868_p2 = pneg %p867_p11  ;;  %p874_p13 = por %p873_p5, %p872_p4 }
  0x37   : > { %p875_p12 = pnand %p874_p13, %p868_p2 }
  0x39   : > { %878 = shalt.err (!%p875_p12)
}
  0x3a   : > { %s879_s5 = scalar_lea.vmem %s1216_s15, 256  ;;  %s1053_s7 = smov [#allocation2]  }
  0x3b   : > { %p880_p8 = scmp.ne.s32.totalorder %s1216_s15, %s879_s5  ;;  %s884_s10 = sshll.u32 %s1053_s7, 4  ;;  %s885_s10 = int_to_ptr.vmem [resolvable:$false] %s884_s10 }
  0x3c   : > { %s886_s16 = scalar_lea.vmem %s885_s10, 512  ;;  %p887_p6 = scmp.lt.s32.totalorder %s1216_s15, %s885_s10 }
  0x3d   : > { %p882_p11 = pnand %p880_p8, %p866_p10  ;;  %p888_p0 = scmp.lt.s32.totalorder %s886_s16, %s879_s5 }
  0x3f   : > { %p883_p7 = pneg %p882_p11  ;;  %p889_p3 = por %p888_p0, %p887_p6 }
  0x41   : > { %p890_p4 = pnand %p889_p3, %p883_p7 }
  0x43   : > { %893 = shalt.err (!%p890_p4)
}
  0x44   : > { %746 = dma.hbm_to_vmem [thread:$0]  (!%p1229_p1), %s1223_s24, 256, %s1216_s15, %s213_s12  }
  0x45   : > { %p1493_p2 = scmp.lt.s32.totalorder %s1051_s28, 9  ;;  %p1494_p6 = scmp.ge.s32.totalorder %s1051_s28, 1 }
  0x46   : > { %s75_s14 = sadd.s32 1, %s1019_s20  ;;  %p82_p12 = scmp.ne.s32.totalorder %s1019_s20, %s1015_s19 }
  0x47   : > { %p1264_p7 = pnand %p1494_p6, %p1493_p2  ;;  %p1496_p13 = scmp.eq.s32.totalorder %s1051_s28, 0 }
  0x48   : > { %s1274_s8 = scalar_select %p1188_p9, %s1019_s20, %s75_s14  }
  0x49   : > { %p84_p5 = por %p82_p12, %p1496_p13  ;;  %p88_p10 = scmp.ne.s32.totalorder %s1015_s19, %s1011_s18 }
  0x4a   : > { %s233_s17 = sand.u32 1, %s1019_s20   ;;  %s1497_s5 = sshll.u32 %s1213_s30, 7 }
  0x4b   : > { %s630_s24 = scalar_lea.hbm %s1461_s1, %s1497_s5  ;;  %p1498_p1 = scmp.ne.s32.totalorder %s1484_s11, 0 }
  0x4c   : > { %s710_s12 = sshll.u32 %s233_s17, 4  ;;  %s1292_s16 = scalar_lea.hbm %s630_s24, 1024 }
  0x4d   : > { %p1288_p8 = por %p88_p10, %p1498_p1  ;;  %p1500_p11 = scmp.lt.s32.totalorder %s1051_s28, 8 }
  0x4e   : > { %s237_s25 = scalar_lea.vmem [#allocation5], %s710_s12  ;;  %s234_s11 = scalar_lea.sflag [#allocation6], %s233_s17 }
  0x4f   : > { %s1499_s15 = scalar_select %p1288_p8, 1, 0 }
  0x50   : > { %p1296_p9 = pnand %p1500_p11, %p84_p5  ;;  %s248_s30 = sshll.u32 %s237_s25, 4  ;;  %s1300_s30 = int_to_ptr.vmem [resolvable:$true] %s248_s30 }
  0x51   : > { %s924_s14 = scalar_lea.hbm %s630_s24, 1280  ;;  %s899_s10 = scalar_lea.hbm %s1461_s1, 4096 }
  0x52   : > { %p895_p0 = scmp.ne.s32.totalorder %s1292_s16, %s924_s14  ;;  %p896_p3 = pneg %p1296_p9 }
  0x53   : > { %p900_p6 = scmp.lt.u32.totalorder %s1292_s16, %s1461_s1  ;;  %p901_p12 = scmp.lt.u32.totalorder %s899_s10, %s924_s14 }
  0x54   : > { %p897_p4 = pnand %p896_p3, %p895_p0  ;;  %p903_p5 = scmp.lt.u32.totalorder %s924_s14, %s1292_s16 }
  0x55   : > { %p902_p13 = por %p901_p12, %p900_p6 }
  0x56   : > { %p898_p2 = pneg %p897_p4 }
  0x57   : > { %p904_p10 = por %p903_p5, %p902_p13 }
  0x59   : > { %p905_p1 = pnand %p904_p10, %p898_p2 }
  0x5b   : > { %908 = shalt.err (!%p905_p1)
}
  0x5c   : > { %s909_s17 = scalar_lea.vmem %s1300_s30, 256  ;;  %s1054_s24 = smov [#allocation5]  }
  0x5d   : > { %p910_p11 = scmp.ne.s32.totalorder %s1300_s30, %s909_s17  ;;  %s914_s12 = sshll.u32 %s1054_s24, 4  ;;  %s915_s12 = int_to_ptr.vmem [resolvable:$false] %s914_s12 }
  0x5e   : > { %s916_s0 = scalar_lea.vmem %s915_s12, 512  ;;  %p917_p8 = scmp.lt.s32.totalorder %s1300_s30, %s915_s12 }
  0x5f   : > { %p912_p0 = pnand %p910_p11, %p896_p3  ;;  %p918_p6 = scmp.lt.s32.totalorder %s916_s0, %s909_s17 }
  0x61   : > { %p913_p4 = pneg %p912_p0  ;;  %p919_p12 = por %p918_p6, %p917_p8 }
  0x63   : > { %p920_p13 = pnand %p919_p12, %p913_p4 }
  0x65   : > { %923 = shalt.err (!%p920_p13)
}
  0x66   : > { %749 = dma.hbm_to_vmem [thread:$0]  (!%p1296_p9), %s1292_s16, 256, %s1300_s30, %s234_s11  }
  0x67   : > { %257 = sbr.rel (%p1264_p7) target bundleno = 701 (0x2bd), region = 40  ;;  %s1329_s27 = sand.u32 (!%p1264_p7), 1, %s1027_s22  }
  0x68   : > { %s715_s25 = sshll.u32 (!%p1264_p7), %s1329_s27, 4  ;;  %s260_s14 = scalar_lea.sflag (!%p1264_p7), [#allocation3], %s1329_s27 }
  0x69   : > { %s263_s5 = scalar_lea.vmem (!%p1264_p7), [#allocation2], %s715_s25  ;;  %p1502_p8 = scmp.ne.s32.totalorder (!%p1264_p7), %s1486_s13, 0 }
  0x6e   : > { %998 = dma.done.wait (%p1502_p8), %s260_s14, 256  }
  0x6f   : > { %1000 = vsyncadd (%p1502_p8), %s260_s14, 4294967040  ;;  %s268_s16 = sand.u32 1, %s1015_s19   ;;  %p1503_p7 = scmp.ne.s32.totalorder %s1499_s15, 0 }
  0x70   : > { %s716_s18 = sshll.u32 %s268_s16, 4  ;;  %s269_s29 = scalar_lea.sflag [#allocation6], %s268_s16 }
  0x71   : > { %s272_s30 = scalar_lea.vmem [#allocation5], %s716_s18 }
  0x72   : > { %1002 = dma.done.wait (%p1503_p7), %s269_s29, 256  }
  0x73   : > { %1004 = vsyncadd (%p1503_p7), %s269_s29, 4294967040  ;;  %v1055_v0 = vmov 0.0   ;;  %v309_v1 = vld [vmem:[%s272_s30 + $0x8] sm:$0xff]  ;;  %v308_v3 = vld [vmem:[%s272_s30] sm:$0xff]  ;;  %vm314_vm0 = vcmask 64512   ;;  %v1056_v10 = vmov 0  }
  0x74   : > { %385 = vmatprep.mubr.f32.mxu1 %v1055_v0  ;;  %468 = vmatprep.mubr.f32.mxu0 %v1055_v0  ;;  %v307_v2 = vld [vmem:[%s263_s5 + $0x8] sm:$0xff]  ;;  %v306_v4 = vld [vmem:[%s263_s5] sm:$0xff]  ;;  %s717_s15 = sshll.u32 %s1329_s27, 5  ;;  %s1504_s24 = sld [smem:[#allocation11_spill]] }
  0x75   : > { %321 = vmatprep.subr.mxu1 %v309_v1  ;;  %404 = vmatprep.subr.mxu0 %v307_v2  ;;  %v312_v5 = vld [vmem:[%s1463_s3] sm:$0xff]  ;;  %v313_v7 = vld [vmem:[%s1463_s3 + $0x8] sm:$0xff]  ;;  %v483_v11 = vld [vmem:[%s1464_s4 + $0x10] sm:$0xff]  ;;  %s1381_s17 = scalar_lea.vmem [#allocation7], %s717_s15  ;;  %s1505_s12 = sld [smem:[#allocation12_spill]] }
  0x76   : > { %v310_v6 = vld [vmem:[%s1462_s2] sm:$0xff]  ;;  %322 = vmatpush1.msra.mxu1 %v308_v3  ;;  %405 = vmatpush1.msra.mxu0 %v306_v4  ;;  %v311_v8 = vld [vmem:[%s1462_s2 + $0x8] sm:$0xff]  ;;  %v484_v42 = vld [vmem:[%s1464_s4 + $0x18] sm:$0xff]  ;;  %s585_s5 = sshll.u32 %s1381_s17, 4  ;;  %s1506_s30 = sld [smem:[#allocation18_spill]]  ;;  %s1388_s5 = int_to_ptr.vmem [resolvable:$true] %s585_s5 }
  0x77   : > { %718 = vmatmul.mubr.msk.f32.vlgmr.msra.gmra.mrb[0].mxu1 %vm314_vm0, %v312_v5  ;;  %720 = vmatmul.mubr.msk.f32.vlgmr.msra.gmra.mrb[0].mxu0 %vm314_vm0, %v310_v6  ;;  %v485_v9 = vld [vmem:[%s1464_s4 + $0x20] sm:$0xff]  ;;  %v486_v26 = vld [vmem:[%s1464_s4 + $0x28] sm:$0xff]  ;;  %s569_s11 = scalar_lea.sflag [#allocation4], %s1329_s27  ;;  %s925_s7 = scalar_lea.vmem %s1388_s5, 512 }
  0x78   : > { %391 = vmatprep.mubr.f32.mxu1 %v1055_v0  ;;  %474 = vmatprep.mubr.f32.mxu0 %v1055_v0  ;;  %v481_v31 = vld [vmem:[%s1464_s4] sm:$0xff]  ;;  %v482_v36 = vld [vmem:[%s1464_s4 + $0x8] sm:$0xff]  ;;  %p926_p9 = scmp.ne.s32.totalorder %s1388_s5, %s925_s7  ;;  %p1507_p3 = scmp.ne.s32.totalorder %s1489_s6, 0 }
  0x79   : > { %848 = vset.pattern.permute.xlu1 %v1056_v10  ;;  %849 = vset.pattern.permute.xlu0 %v1056_v10  ;;  %s1057_s10 = smov [#allocation7]  }
  0x7a   : > { %524 = vperm.xlu1 %848, %v485_v9   ;;  %s732_s0 = sshll.u32 %s1504_s24, 2  ;;  %p927_p2 = pnand %p926_p9, %p1507_p3 }
  0x7b   : > { %719 = vmatmul.mubr.msk.f32.gmra.mrb[2].mxu1 %vm314_vm0, %v313_v7  ;;  %721 = vmatmul.mubr.msk.f32.gmra.mrb[2].mxu0 %vm314_vm0, %v311_v8  ;;  %s728_s25 = sshll.u32 %s1505_s12, 4  ;;  %s929_s15 = sshll.u32 %s1057_s10, 4  ;;  %s930_s15 = int_to_ptr.vmem [resolvable:$false] %s929_s15 }
  0x7c   : > { %s582_s14 = sadd.s32 %s732_s0, %s728_s25  ;;  %p928_p5 = pneg %p927_p2 }
  0x7d   : > { %s729_s16 = sshll.u32 %s582_s14, 7  ;;  %s931_s24 = scalar_lea.vmem %s930_s15, 1024 }
  0x7e   : > { %538 = vperm.xlu1 %848, %v483_v11   ;;  %s1394_s13 = scalar_lea.hbm %s1506_s30, %s729_s16  ;;  %p932_p10 = scmp.lt.s32.totalorder %s1388_s5, %s930_s15 }
  0x7f   : > { %p933_p1 = scmp.lt.s32.totalorder %s931_s24, %s925_s7 }
  0x81   : > { %p934_p11 = por %p933_p1, %p932_p10 }
  0x83   : > { %p935_p0 = pnand %p934_p11, %p928_p5 }
  0xf9   : > { %v525_v45 = vpop.permute.xlu1 %524 }
  0xfd   : > { %v539_v46 = vpop.permute.xlu1 %538 }
 0x14a   : > { %v387_v12 = vpop.f32.mrb[0].mxu1  ;;  %v470_v13 = vpop.f32.mrb[0].mxu0 }
 0x14b   : > { %v471_v14 = vadd.f32 %v470_v13, %v387_v12  ;;  %v389_v15 = vpop.f32.mrb[1].mxu1  ;;  %v472_v16 = vpop.f32.mrb[1].mxu0 }
 0x14c   : > { %v473_v17 = vadd.f32 %v472_v16, %v389_v15 }
 0x14e   : > { %v393_v18 = vpop.f32.mrb[2].mxu1  ;;  %v476_v19 = vpop.f32.mrb[2].mxu0  ;;  %v487_v25 = vadd.f32 %v473_v17, %v471_v14 }
 0x14f   : > { %v1360_v20 = vadd.f32 %v476_v19, %v393_v18  ;;  %v395_v21 = vpop.f32.mrb[3].mxu1  ;;  %v478_v22 = vpop.f32.mrb[3].mxu0 }
 0x150   : > { %v1362_v23 = vadd.f32 %v478_v22, %v395_v21 }
 0x152   : > { %v506_v24 = vadd.f32 %v1362_v23, %v1360_v20 }
 0x154   : > { %507 = vadd.xlane.f32.xlu0 %v506_v24 }
 0x158   : > { %488 = vadd.xlane.f32.xlu0 %v487_v25 }
 0x16e   : > { %531 = vperm.xlu0 %849, %v486_v26  }
 0x1e1   : > { %v508_v27 = vpop.xlane.xlu0 %507 }
 0x1e2   : > { %v509_v28 = vmul.f32 0.00390625, %v508_v27 }
 0x1e4   : > { %v510_v29 = vsub.f32 %v1360_v20, %v509_v28  ;;  %v511_v30 = vsub.f32 %v1362_v23, %v509_v28 }
 0x1e5   : > { %v489_v32 = vpop.xlane.xlu0 %488 }
 0x1e6   : > { %v490_v33 = vmul.f32 0.00390625, %v489_v32  ;;  %v512_v34 = vmul.f32 %v510_v29, %v510_v29  ;;  %v513_v35 = vmul.f32 %v511_v30, %v511_v30 }
 0x1e8   : > { %v491_v37 = vmul.f32 %v490_v33, %v481_v31  ;;  %v514_v38 = vadd.f32 %v513_v35, %v512_v34 }
 0x1ea   : > { %v492_v39 = vadd.f32 %v491_v37, %v482_v36  ;;  %515 = vadd.xlane.f32.xlu1 %v514_v38 }
 0x1ec   : > { %v722_v40 = vmul.f32 -1.442695, %v492_v39 }
 0x1ed   : > { %v532_v57 = vpop.permute.xlu0 %531 }
 0x1ee   : > { %850 = vpow2.f32 %v722_v40 }
 0x1f8   : > { %v851_v41 = vpop.eup %850 }
 0x1f9   : > { %v496_v43 = vadd.f32 1.0, %v851_v41 }
 0x1fb   : > { %852 = vrcp.f32 %v496_v43  ;;  %545 = vperm.xlu1 %848, %v484_v42  }
 0x205   : > { %v853_v44 = vpop.eup %852 }
 0x206   : > { %501 = vperm.xlu1 %848, %v853_v44  }
 0x277   : > { %v516_v47 = vpop.xlane.xlu1 %515 }
 0x278   : > { %v517_v48 = vmul.f32 0.00390625, %v516_v47 }
 0x27a   : > { %v518_v49 = vadd.f32 1e-05, %v517_v48 }
 0x27b   : > { %v546_v50 = vpop.permute.xlu1 %545 }
 0x27c   : > { %854 = vrsqrt.f32 %v518_v49 }
 0x285   : > { %v502_v51 = vpop.permute.xlu1 %501 }
 0x286   : > { %v855_v52 = vpop.eup %854  ;;  %v504_v53 = vmul.f32 %v502_v51, %v471_v14  ;;  %v505_v54 = vmul.f32 %v502_v51, %v473_v17 }
 0x287   : > { %v520_v55 = vmul.f32 %v855_v52, %v510_v29  ;;  %v521_v56 = vmul.f32 %v855_v52, %v511_v30 }
 0x288   : > { %564 = vst [vmem:[%s1381_s17] sm:$0xff] %v504_v53  ;;  %565 = vst [vmem:[%s1381_s17 + $0x8] sm:$0xff] %v505_v54 }
 0x289   : > { %v527_v58 = vmul.f32 %v525_v45, %v520_v55  ;;  %v528_v59 = vmul.f32 %v525_v45, %v521_v56 }
 0x28b   : > { %v534_v60 = vadd.f32 %v532_v57, %v527_v58  ;;  %v535_v61 = vadd.f32 %v532_v57, %v528_v59 }
 0x28d   : > { %v541_v62 = vmul.f32 %v539_v46, %v534_v60  ;;  %v542_v63 = vmul.f32 %v539_v46, %v535_v61 }
 0x28f   : > { %v548_v0 = vadd.f32 %v546_v50, %v541_v62  ;;  %v549_v1 = vadd.f32 %v546_v50, %v542_v63 }
 0x291   : > { %v723_v2 = vmul.f32 -1.442695, %v548_v0  ;;  %v724_v3 = vmul.f32 -1.442695, %v549_v1 }
 0x293   : > { %856 = vpow2.f32 %v723_v2 }
 0x294   : > { %858 = vpow2.f32 %v724_v3 }
 0x29d   : > { %v857_v4 = vpop.eup %856 }
 0x29e   : > { %v859_v5 = vpop.eup %858  ;;  %v556_v6 = vadd.f32 1.0, %v857_v4 }
 0x29f   : > { %v557_v7 = vadd.f32 1.0, %v859_v5 }
 0x2a0   : > { %860 = vrcp.f32 %v556_v6 }
 0x2a1   : > { %862 = vrcp.f32 %v557_v7 }
 0x2aa   : > { %v861_v8 = vpop.eup %860 }
 0x2ab   : > { %v863_v9 = vpop.eup %862  ;;  %v562_v10 = vmul.f32 %v861_v8, %v1360_v20 }
 0x2ac   : > { %v563_v11 = vmul.f32 %v863_v9, %v1362_v23 }
 0x2ad   : > { %566 = vst [vmem:[%s1381_s17 + $0x10] sm:$0xff] %v562_v10 }
 0x2ae   : > { %567 = vst [vmem:[%s1381_s17 + $0x18] sm:$0xff] %v563_v11 }
 0x2af   : > { %938 = shalt.err (!%p935_p0)
}
 0x2b0   : > { %s939_s17 = scalar_lea.hbm %s1394_s13, 512  ;;  %s943_s25 = scalar_lea.hbm %s1506_s30, 4096 }
 0x2b1   : > { %p940_p4 = scmp.ne.s32.totalorder %s1394_s13, %s939_s17  ;;  %p944_p13 = scmp.lt.u32.totalorder %s1394_s13, %s1506_s30 }
 0x2b2   : > { %p945_p8 = scmp.lt.u32.totalorder %s943_s25, %s939_s17  ;;  %p947_p9 = scmp.lt.u32.totalorder %s939_s17, %s1394_s13 }
 0x2b3   : > { %p941_p6 = pnand %p940_p4, %p1507_p3 }
 0x2b4   : > { %p946_p7 = por %p945_p8, %p944_p13 }
 0x2b5   : > { %p942_p12 = pneg %p941_p6 }
 0x2b6   : > { %p948_p2 = por %p947_p9, %p946_p7 }
 0x2b8   : > { %p949_p5 = pnand %p948_p2, %p942_p12 }
 0x2ba   : > { %952 = shalt.err (!%p949_p5)
}
 0x2bb   : > { %s1058_s18 = smov 256   ;;  %s1059_s29 = smov 16  }
 0x2bc   : > { %741 = dma.vmem_to_hbm [thread:$0]  (%p1507_p3), %s1388_s5, 512, %s1394_s13, %s569_s11, %s1058_s18, %s1058_s18, %s1059_s29  }
 0x2bd PF: > { %p755_p10 = scmp.ge.s32.totalorder %s1051_s28, 2  ;;  %s600_s7 = sand.u32 1, %s1023_s21  }
 0x2be   : > { %p1508_p1 = scmp.ne.s32.totalorder %s1490_s9, 0  ;;  %s601_s10 = scalar_lea.sflag [#allocation4], %s600_s7 }
 0x2c0   : > { %p751_p11 = pnand %p755_p10, %p1508_p1 }
 0x2c2   : > { %1006 = dma.done.wait (!%p751_p11), %s601_s10, 512  }
 0x2c3   : > { %1008 = vsyncadd (!%p751_p11), %s601_s10, 4294966784  ;;  %s24_s28 = sadd.s32 1, %s1051_s28   ;;  %s1509_s6 = sld [smem:[#allocation16_spill]] }
 0x2c4   : > { %p21_p0 = scmp.ge.s32.totalorder %s24_s28, 10   ;;  %s1510_s25 = sld [smem:[#allocation13_spill]] }
 0x2c5   : > { %s1511_s27 = sld [smem:[#allocation14_spill]]  ;;  %s1512_s5 = sld [smem:[#allocation15_spill]] }
 0x2c6   : > { %s1513_s18 = smov %s1015_s19  ;;  %s1514_s19 = smov %s1019_s20 }
 0x2c7   : > { %s1515_s20 = smov %s1274_s8  ;;  %s1516_s21 = smov %s1027_s22 }
 0x2c8   : > { %s1517_s22 = smov %s1031_s23  ;;  %s1519_s24 = smov %s1043_s26 }
 0x2c9   : > { %s1518_s23 = smov %s1509_s6  ;;  %23 = sbr.rel (!%p21_p0) target bundleno = 14 (0xe), region = 98 }
 0x2cb   : > { %s1520_s26 = smov %s1511_s27  ;;  %s1521_s27 = smov %s1512_s5 }
 0x2d0   :  { %606 = vsyncpa [#allocation3], 1 }
 0x2d1   :  { %608 = vsyncpa [#allocation3 + $0x1], 1 }
 0x2d2   :  { %609 = vsyncpa [#allocation6], 1 }
 0x2d3   :  { %611 = vsyncpa [#allocation6 + $0x1], 1 }
 0x2d4   :  { %612 = vsyncpa [#allocation4], 1 }
 0x2d5   :  { %614 = vsyncpa [#allocation4 + $0x1], 1 }

</bundles_post_ra>
